<compile_context>
chip_gen: v7x
topology: tpu7x:2x2x1
jax: 0.10.0
libtpu: 0.0.40
codegen_flags: <defaults>
</compile_context>

<pallas_src>
import functools
import math

import numpy as np
import jax
import jax.numpy as jnp
from jax.experimental import pallas as pl
from jax.experimental.pallas import tpu as pltpu


def get_dct_matrix(N):
    dct_m = np.eye(N)
    for k in np.arange(N):
        for i in np.arange(N):
            w = np.sqrt(2 / N)
            if k == 0:
                w = np.sqrt(1 / N)
            dct_m[k, i] = w * np.cos(np.pi * (i + 1 / 2) * k / N)
    idct_m = np.linalg.inv(dct_m)
    return dct_m, idct_m


# ----------------------------------------------------------------------------
# Kernel
# ----------------------------------------------------------------------------
def _dct_mhsa_kernel(src_ref, wqkv_ref, bqkv_ref, wout_ref, bout_ref, out_ref,
                     *, b_tile, seq_len, num_heads, head_dim):
    f32 = jnp.float32
    H, hd, S = num_heads, head_dim, seq_len
    rows = b_tile * S

    x = src_ref[...]                                     # (rows, dct_n)

    # Head-batched fused QKV projection: one rank-3 batched matmul over the
    # 3*H (q/k/v x head) slots.  q-scale is folded host-side.
    xb = jnp.broadcast_to(x[None], (3 * H,) + x.shape)   # hoisted, done once
    qkv = jnp.einsum('nrd,ndc->nrc', xb, wqkv_ref[...],
                     preferred_element_type=f32)
    qkv = qkv + bqkv_ref[...]                            # bias add in f32

    # (3H, rows, hd) -> per q/k/v (H*b_tile, S, hd): leading-dim slices plus a
    # tile-aligned sublane split (S % 8 == 0) -> no lane relayouts, no concat.
    def _heads(t):
        return qkv[t * H:(t + 1) * H].reshape(H * b_tile, S, hd)

    q, k, v = _heads(0), _heads(1), _heads(2)

    # Batched attention over a single batch dim n = H * b_tile.
    s = jnp.einsum('nqc,nkc->nqk', q, k, preferred_element_type=f32)
    s = s - jnp.max(s, axis=-1, keepdims=True)
    p = jnp.exp(s)
    denom = jnp.sum(p, axis=-1, keepdims=True)
    p = p * pl.reciprocal(denom, approx=False)           # exact normalization
    o = jnp.einsum('nqk,nkc->nqc', p, v, preferred_element_type=f32)

    # Fused out-projection + inverse DCT: per-head contraction, then a
    # leading-dim sum over heads (plain vreg adds, no cross-lane work).
    o_h = o.reshape(H, rows, hd)
    tmp = jnp.einsum('hrc,hcd->hrd', o_h, wout_ref[...],
                     preferred_element_type=f32)
    out = jnp.sum(tmp, axis=0) + bout_ref[...]

    out_ref[...] = out.astype(out_ref.dtype)             # (rows, dct_n) store


# ----------------------------------------------------------------------------
# Host-side weight fusion
# ----------------------------------------------------------------------------
def fuse_params(raw, *, dct_n, d_model, num_heads, kernel_size,
                matmul_dtype=jnp.float32):
    """Fold DCT/IDCT + module linears + MHA in/out projections into 4 slabs,
    laid out with heads on a leading batch axis."""
    wq, bq, wk, bk, wv, bv, in_proj_w, in_proj_b, wo, bo = raw
    H = num_heads
    hd = d_model // num_heads

    dct_m, idct_m = get_dct_matrix(kernel_size)
    dct_sub = jnp.asarray(dct_m[:dct_n, :], jnp.float32)     # (dct_n, in_feat)
    idct_sub = jnp.asarray(idct_m[:, :dct_n], jnp.float32)   # (d_model, dct_n)

    wiq, wik, wiv = (in_proj_w[:d_model],
                     in_proj_w[d_model:2 * d_model],
                     in_proj_w[2 * d_model:])
    biq, bik, biv = (in_proj_b[:d_model],
                     in_proj_b[d_model:2 * d_model],
                     in_proj_b[2 * d_model:])

    scale = 1.0 / math.sqrt(hd)
    wq_f = (dct_sub @ wq.T @ wiq.T) * scale                  # (dct_n, d_model)
    bq_f = (bq @ wiq.T + biq) * scale
    wk_f = dct_sub @ wk.T @ wik.T
    bk_f = bk @ wik.T + bik
    wv_f = dct_sub @ wv.T @ wiv.T
    bv_f = bv @ wiv.T + biv

    def per_head_w(w):   # (dct_n, d_model) -> (H, dct_n, hd), head-major cols
        return jnp.transpose(w.reshape(dct_n, H, hd), (1, 0, 2))

    def per_head_b(b):   # (d_model,) -> (H, 1, hd)
        return b.reshape(H, 1, hd)

    w_qkv = jnp.concatenate(
        [per_head_w(wq_f), per_head_w(wk_f), per_head_w(wv_f)], axis=0)
    b_qkv = jnp.concatenate(
        [per_head_b(bq_f), per_head_b(bk_f), per_head_b(bv_f)], axis=0)

    w_out = (wo.T @ idct_sub).reshape(H, hd, dct_n)          # (H, hd, dct_n)
    b_out = (bo @ idct_sub)[None, :]                         # (1, dct_n)

    # Only matmul operands optionally go bf16; biases / accumulation stay f32.
    return (w_qkv.astype(matmul_dtype), b_qkv.astype(jnp.float32),
            w_out.astype(matmul_dtype), b_out.astype(jnp.float32))


# ----------------------------------------------------------------------------
# Wrapper
# ----------------------------------------------------------------------------
def _pick_b_tile(bs, seq_len, max_rows=2048):
    """Largest batch tile such that (a) rows-per-step <= max_rows (keeps the
    per-step VMEM footprint small even on v7x's 64 MiB) and (b) the grid keeps
    >= 2 steps whenever bs >= 2 (DMA/compute overlap + megacore sharding)."""
    best = 1
    for cand in range(1, bs + 1):
        if bs % cand:
            continue
        if cand * seq_len > max_rows:
            break
        if bs >= 2 and bs // cand < 2:
            continue
        best = cand
    return best


def dct_mhsa_forward(src, fused_params, *, num_heads, d_model, b_tile=None,
                     max_rows=2048):
    bs, seq_len, dct_n = src.shape
    w_qkv, b_qkv, w_out, b_out = fused_params
    assert d_model % num_heads == 0
    head_dim = d_model // num_heads

    # seq_len on a sublane boundary keeps the in-kernel rows -> (b, S) split
    # tile-aligned (free); see TODO at top for general seq_len.
    assert seq_len % 8 == 0, "seq_len must be a multiple of 8 (sublane tile)"

    if b_tile is None:
        b_tile = _pick_b_tile(bs, seq_len, max_rows)
    assert bs % b_tile == 0, "batch must be divisible by b_tile"
    rows = b_tile * seq_len
    assert rows % 8 == 0, "rows per grid step must be a multiple of 8"
    grid = (bs // b_tile,)

    # Cast src to bf16 only when the weights are bf16 AND the row block stays
    # on the packed (16,128) sublane tile; otherwise keep it f32.
    src_dtype = jnp.float32
    if w_qkv.dtype == jnp.bfloat16 and rows % 16 == 0:
        src_dtype = jnp.bfloat16
    src2 = src.reshape(bs * seq_len, dct_n).astype(src_dtype)

    kernel = functools.partial(_dct_mhsa_kernel, b_tile=b_tile,
                               seq_len=seq_len, num_heads=num_heads,
                               head_dim=head_dim)

    def full_spec(a):
        n = a.ndim
        return pl.BlockSpec(a.shape, lambda b, n=n: (0,) * n)

    out = pl.pallas_call(
        kernel,
        out_shape=jax.ShapeDtypeStruct((bs * seq_len, dct_n), jnp.float32),
        grid_spec=pltpu.PrefetchScalarGridSpec(
            num_scalar_prefetch=0,
            grid=grid,
            in_specs=[pl.BlockSpec((rows, dct_n), lambda b: (b, 0)),
                      full_spec(w_qkv), full_spec(b_qkv),
                      full_spec(w_out), full_spec(b_out)],
            out_specs=pl.BlockSpec((rows, dct_n), lambda b: (b, 0)),
        ),
        compiler_params=pltpu.CompilerParams(
            dimension_semantics=("parallel",)),   # batch tiles are independent
    )(src2, w_qkv, b_qkv, w_out, b_out)

    # No slicing pass: the kernel already stored dct_n-wide rows.
    return out.reshape(bs, seq_len, dct_n)


# ----------------------------------------------------------------------------
# Pure-JAX (unfused) reference for validation
# ----------------------------------------------------------------------------
def reference_forward(src, raw, *, dct_n, d_model, num_heads, kernel_size):
    wq, bq, wk, bk, wv, bv, in_w, in_b, wo, bo = raw
    dct_m, idct_m = get_dct_matrix(kernel_size)
    dct_sub = jnp.asarray(dct_m[:dct_n, :], jnp.float32)
    idct_sub = jnp.asarray(idct_m[:, :dct_n], jnp.float32)
    bs, S, _ = src.shape
    hd = d_model // num_heads

    x = src @ dct_sub
    q = x @ wq.T + bq
    k = x @ wk.T + bk
    v = x @ wv.T + bv
    q = q @ in_w[:d_model].T + in_b[:d_model]
    k = k @ in_w[d_model:2 * d_model].T + in_b[d_model:2 * d_model]
    v = v @ in_w[2 * d_model:].T + in_b[2 * d_model:]

    q = q.reshape(bs, S, num_heads, hd)
    k = k.reshape(bs, S, num_heads, hd)
    v = v.reshape(bs, S, num_heads, hd)
    s = jnp.einsum('bqhc,bkhc->bhqk', q, k) / math.sqrt(hd)
    p = jax.nn.softmax(s, axis=-1)
    o = jnp.einsum('bhqk,bkhc->bqhc', p, v).reshape(bs, S, d_model)
    o = o @ wo.T + bo
    return o @ idct_sub


# ----------------------------------------------------------------------------
if __name__ == "__main__":
    bs, seq_len = 2, 8
    in_features = kernel_size = d_model = 32   # module shape-consistency needs
    dct_n = 8                                  # in_features == kernel_size == d_model
    num_heads = 4

    key = jax.random.PRNGKey(0)
    keys = jax.random.split(key, 11)

    def uinit(k, shape, fan_in):
        bound = 1.0 / math.sqrt(fan_in)
        return jax.random.uniform(k, shape, jnp.float32, -bound, bound)

    # Raw (PyTorch-layout) parameters.
    wq = uinit(keys[0], (d_model, in_features), in_features)
    bq = uinit(keys[1], (d_model,), in_features)
    wk = uinit(keys[2], (d_model, in_features), in_features)
    bk = uinit(keys[3], (d_model,), in_features)
    wv = uinit(keys[4], (d_model, in_features), in_features)
    bv = uinit(keys[5], (d_model,), in_features)
    in_proj_w = uinit(keys[6], (3 * d_model, d_model), d_model)
    in_proj_b = uinit(keys[7], (3 * d_model,), d_model)
    wo = uinit(keys[8], (d_model, d_model), d_model)
    bo = uinit(keys[9], (d_model,), d_model)
    raw = (wq, bq, wk, bk, wv, bv, in_proj_w, in_proj_b, wo, bo)

    src = jax.random.normal(keys[10], (bs, seq_len, dct_n), jnp.float32)

    # Pure-JAX unfused reference (f32).
    ref = reference_forward(src, raw, dct_n=dct_n, d_model=d_model,
                            num_heads=num_heads, kernel_size=kernel_size)

    # --- f32 path (default) ---
    fused = fuse_params(raw, dct_n=dct_n, d_model=d_model,
                        num_heads=num_heads, kernel_size=kernel_size)
    out = dct_mhsa_forward(src, fused, num_heads=num_heads, d_model=d_model)
    out = jax.block_until_ready(out)
    assert out.shape == (bs, seq_len, dct_n)
    assert bool(jnp.all(jnp.isfinite(out)))
    max_err = float(jnp.max(jnp.abs(out - ref)))
    assert max_err < 5e-3, f"f32 max abs error vs reference: {max_err}"

    # --- bf16 matmul-operand path (v6e/v7x DMA-byte optimization) ---
    fused_bf16 = fuse_params(raw, dct_n=dct_n, d_model=d_model,
                             num_heads=num_heads, kernel_size=kernel_size,
                             matmul_dtype=jnp.bfloat16)
    out_bf16 = jax.block_until_ready(
        dct_mhsa_forward(src, fused_bf16, num_heads=num_heads, d_model=d_model))
    max_err_bf16 = float(jnp.max(jnp.abs(out_bf16 - ref)))
    assert max_err_bf16 < 2e-2, f"bf16 max abs error vs reference: {max_err_bf16}"

    print("KERNEL_OK")
</pallas_src>

<mosaic_0001>
module attributes {stable_mosaic.version = 11 : i64} {
  func.func @_dct_mhsa_kernel(%arg0: i32, %arg1: memref<8x8xf32, #tpu.memory_space<vmem>>, %arg2: memref<12x8x8xf32, #tpu.memory_space<vmem>>, %arg3: memref<12x1x8xf32, #tpu.memory_space<vmem>>, %arg4: memref<4x8x8xf32, #tpu.memory_space<vmem>>, %arg5: memref<1x8xf32, #tpu.memory_space<vmem>>, %arg6: memref<8x8xf32, #tpu.memory_space<vmem>>) attributes {dimension_semantics = [#tpu.dimension_semantics<parallel>], iteration_bounds = array<i64: 2>, scalar_prefetch = 0 : i64, scratch_operands = 0 : i64, tpu.core_type = #tpu.core_type<tc>, window_params = [{transform_indices = @transform_0, window_bounds = array<i64: 8, 8>}, {pipeline_mode = #tpu.pipeline_mode<synchronous>, transform_indices = @transform_1, window_bounds = array<i64: 12, 8, 8>}, {pipeline_mode = #tpu.pipeline_mode<synchronous>, transform_indices = @transform_2, window_bounds = array<i64: 12, 1, 8>}, {pipeline_mode = #tpu.pipeline_mode<synchronous>, transform_indices = @transform_3, window_bounds = array<i64: 4, 8, 8>}, {pipeline_mode = #tpu.pipeline_mode<synchronous>, transform_indices = @transform_4, window_bounds = array<i64: 1, 8>}, {transform_indices = @transform_5, window_bounds = array<i64: 8, 8>}]} {
    %c0 = arith.constant 0 : index
    %c0_0 = arith.constant 0 : index
    %0 = vector.load %arg1[%c0, %c0_0] : memref<8x8xf32, #tpu.memory_space<vmem>>, vector<8x8xf32>
    %1 = vector.shape_cast %0 : vector<8x8xf32> to vector<1x8x8xf32>
    %2 = vector.shape_cast %1 : vector<1x8x8xf32> to vector<1x8x8xf32>
    %3 = vector.broadcast %2 : vector<1x8x8xf32> to vector<12x8x8xf32>
    %c0_1 = arith.constant 0 : index
    %c0_2 = arith.constant 0 : index
    %c0_3 = arith.constant 0 : index
    %4 = vector.load %arg2[%c0_1, %c0_2, %c0_3] : memref<12x8x8xf32, #tpu.memory_space<vmem>>, vector<12x8x8xf32>
    "tpu.trace_start"() <{level = 10 : i32, message = "nrd,ndc->nrc"}> : () -> ()
    %cst = arith.constant dense<0.000000e+00> : vector<12x8x8xf32>
    %5 = tpu.matmul %3, %4, %cst {dimension_numbers = #tpu.dot_dimension_numbers<[2], [1], [1], [2], [0, 0, 0, 1, 1, 2], [0], [0]>} : vector<12x8x8xf32>, vector<12x8x8xf32>, vector<12x8x8xf32> -> vector<12x8x8xf32>
    "tpu.trace_stop"() : () -> ()
    %c0_4 = arith.constant 0 : index
    %c0_5 = arith.constant 0 : index
    %c0_6 = arith.constant 0 : index
    %6 = vector.load %arg3[%c0_4, %c0_5, %c0_6] : memref<12x1x8xf32, #tpu.memory_space<vmem>>, vector<12x1x8xf32>
    %7 = vector.broadcast %6 : vector<12x1x8xf32> to vector<12x8x8xf32>
    %8 = arith.addf %5, %7 : vector<12x8x8xf32>
    %9 = vector.extract_strided_slice %8 {offsets = [0, 0, 0], sizes = [4, 8, 8], strides = [1, 1, 1]} : vector<12x8x8xf32> to vector<4x8x8xf32>
    %10 = vector.extract_strided_slice %8 {offsets = [4, 0, 0], sizes = [4, 8, 8], strides = [1, 1, 1]} : vector<12x8x8xf32> to vector<4x8x8xf32>
    %11 = vector.extract_strided_slice %8 {offsets = [8, 0, 0], sizes = [4, 8, 8], strides = [1, 1, 1]} : vector<12x8x8xf32> to vector<4x8x8xf32>
    "tpu.trace_start"() <{level = 10 : i32, message = "nqc,nkc->nqk"}> : () -> ()
    %cst_7 = arith.constant dense<0.000000e+00> : vector<4x8x8xf32>
    %12 = tpu.matmul %9, %10, %cst_7 {dimension_numbers = #tpu.dot_dimension_numbers<[2], [2], [1], [1], [0, 0, 0, 1, 1, 1], [0], [0]>} : vector<4x8x8xf32>, vector<4x8x8xf32>, vector<4x8x8xf32> -> vector<4x8x8xf32>
    "tpu.trace_stop"() : () -> ()
    %cst_8 = arith.constant dense<0xFF800000> : vector<4x8xf32>
    %13 = vector.multi_reduction <maximumf>, %12, %cst_8 [2] : vector<4x8x8xf32> to vector<4x8xf32>
    %14 = vector.shape_cast %13 : vector<4x8xf32> to vector<4x8x1xf32>
    %15 = vector.broadcast %14 : vector<4x8x1xf32> to vector<4x8x8xf32>
    %16 = arith.subf %12, %15 : vector<4x8x8xf32>
    %17 = math.exp %16 : vector<4x8x8xf32>
    %cst_9 = arith.constant dense<0.000000e+00> : vector<4x8xf32>
    %18 = vector.multi_reduction <add>, %17, %cst_9 [2] : vector<4x8x8xf32> to vector<4x8xf32>
    %19 = vector.shape_cast %18 : vector<4x8xf32> to vector<4x8x1xf32>
    %20 = tpu.reciprocal %19 : vector<4x8x1xf32> -> vector<4x8x1xf32>
    %21 = vector.broadcast %20 : vector<4x8x1xf32> to vector<4x8x8xf32>
    %22 = arith.mulf %17, %21 : vector<4x8x8xf32>
    "tpu.trace_start"() <{level = 10 : i32, message = "nqk,nkc->nqc"}> : () -> ()
    %cst_10 = arith.constant dense<0.000000e+00> : vector<4x8x8xf32>
    %23 = tpu.matmul %22, %11, %cst_10 {dimension_numbers = #tpu.dot_dimension_numbers<[2], [1], [1], [2], [0, 0, 0, 1, 1, 2], [0], [0]>} : vector<4x8x8xf32>, vector<4x8x8xf32>, vector<4x8x8xf32> -> vector<4x8x8xf32>
    "tpu.trace_stop"() : () -> ()
    %c0_11 = arith.constant 0 : index
    %c0_12 = arith.constant 0 : index
    %c0_13 = arith.constant 0 : index
    %24 = vector.load %arg4[%c0_11, %c0_12, %c0_13] : memref<4x8x8xf32, #tpu.memory_space<vmem>>, vector<4x8x8xf32>
    "tpu.trace_start"() <{level = 10 : i32, message = "hrc,hcd->hrd"}> : () -> ()
    %cst_14 = arith.constant dense<0.000000e+00> : vector<4x8x8xf32>
    %25 = tpu.matmul %23, %24, %cst_14 {dimension_numbers = #tpu.dot_dimension_numbers<[2], [1], [1], [2], [0, 0, 0, 1, 1, 2], [0], [0]>} : vector<4x8x8xf32>, vector<4x8x8xf32>, vector<4x8x8xf32> -> vector<4x8x8xf32>
    "tpu.trace_stop"() : () -> ()
    %cst_15 = arith.constant dense<0.000000e+00> : vector<8x8xf32>
    %26 = vector.multi_reduction <add>, %25, %cst_15 [0] : vector<4x8x8xf32> to vector<8x8xf32>
    %c0_16 = arith.constant 0 : index
    %c0_17 = arith.constant 0 : index
    %27 = vector.load %arg5[%c0_16, %c0_17] : memref<1x8xf32, #tpu.memory_space<vmem>>, vector<1x8xf32>
    %28 = vector.broadcast %27 : vector<1x8xf32> to vector<8x8xf32>
    %29 = arith.addf %26, %28 : vector<8x8xf32>
    %c0_18 = arith.constant 0 : index
    %c0_19 = arith.constant 0 : index
    %30 = vector.load %arg6[%c0_18, %c0_19] : memref<8x8xf32, #tpu.memory_space<vmem>>, vector<8x8xf32>
    tpu.vector_store %arg6[%c0_18, %c0_19], %29 {strides = array<i32>} : memref<8x8xf32, #tpu.memory_space<vmem>>, vector<8x8xf32>,
    return
  }
  func.func @transform_0(%arg0: i32) -> (i32, i32) {
    %c0_i32 = arith.constant 0 : i32
    %c0_i32_0 = arith.constant 0 : i32
    return %arg0, %c0_i32 : i32, i32
  }
  func.func @transform_1(%arg0: i32) -> (i32, i32, i32) {
    %c0_i32 = arith.constant 0 : i32
    %c0_i32_0 = arith.constant 0 : i32
    %c0_i32_1 = arith.constant 0 : i32
    %c0_i32_2 = arith.constant 0 : i32
    return %c0_i32, %c0_i32_0, %c0_i32_1 : i32, i32, i32
  }
  func.func @transform_2(%arg0: i32) -> (i32, i32, i32) {
    %c0_i32 = arith.constant 0 : i32
    %c0_i32_0 = arith.constant 0 : i32
    %c0_i32_1 = arith.constant 0 : i32
    %c0_i32_2 = arith.constant 0 : i32
    return %c0_i32, %c0_i32_0, %c0_i32_1 : i32, i32, i32
  }
  func.func @transform_3(%arg0: i32) -> (i32, i32, i32) {
    %c0_i32 = arith.constant 0 : i32
    %c0_i32_0 = arith.constant 0 : i32
    %c0_i32_1 = arith.constant 0 : i32
    %c0_i32_2 = arith.constant 0 : i32
    return %c0_i32, %c0_i32_0, %c0_i32_1 : i32, i32, i32
  }
  func.func @transform_4(%arg0: i32) -> (i32, i32) {
    %c0_i32 = arith.constant 0 : i32
    %c0_i32_0 = arith.constant 0 : i32
    %c0_i32_1 = arith.constant 0 : i32
    return %c0_i32, %c0_i32_0 : i32, i32
  }
  func.func @transform_5(%arg0: i32) -> (i32, i32) {
    %c0_i32 = arith.constant 0 : i32
    %c0_i32_0 = arith.constant 0 : i32
    return %arg0, %c0_i32 : i32, i32
  }
}

</mosaic_0001>

<bundles_post_ra>
// kernel: tpu_custom_call.1
= control target key start
LH: loop header
LB: loop body
LE: loop exit
PB: predicated region body
PF: predicated region fallthrough
CT: control target
= control target key end

     0   :  { %s2450_s18 = smov 0   ;;  %s2677_s0 = inlined_call_operand.vmem [shape: f32[16,8], index: 0, kind: input, shape index: {}]   ;;  %s2678_s1 = inlined_call_operand.vmem [shape: f32[12,8,8], index: 1, kind: input, shape index: {}]   ;;  %s2679_s2 = inlined_call_operand.vmem [shape: f32[12,1,8], index: 2, kind: input, shape index: {}]   ;;  %s2680_s3 = inlined_call_operand.vmem [shape: f32[4,8,8], index: 3, kind: input, shape index: {}]   ;;  %s2681_s4 = inlined_call_operand.vmem [shape: f32[1,8], index: 4, kind: input, shape index: {}]   ;;  %s2682_s5 = inlined_call_operand.vmem [shape: f32[16,8], index: 5, kind: output, shape index: {}]  }
   0x1 LB: > { %s2166_s19 = sadd.s32 4294967295, %s2416_s18   ;;  %p2170_p0 = scmp.ge.s32.totalorder %s2416_s18, 1  ;;  %s2416_s18 = sphi %s2450_s18, %s15_s18  }
   0x2   : > { %p186_p1 = scmp.lt.s32.totalorder %s2416_s18, 3 }
   0x4   : > { %p187_p2 = pnand %p2170_p0, %p186_p1 }
   0x5   : > { %v221_v0 = vld [vmem:[%s2678_s1] sm:$0xff] (!%p187_p2)  ;;  %v222_v1 = vld [vmem:[%s2678_s1 + $0x8] sm:$0xff] (!%p187_p2)  ;;  %p212_p3 = scmp.lt.s32.totalorder (!%p187_p2), %s2166_s19, 1  ;;  %v2418_v2 = vmov (!%p187_p2), 0.0   ;;  %vm2419_vm0 = vmmov (!%p187_p2), 0   ;;  %vm317_vm1 = vcmask (!%p187_p2), 64512  }
   0x6   : > { %190 = sbr.rel (%p187_p2) target bundleno = 1206 (0x4b6), region = 40  ;;  %2264 = vmatprep.subr.mxu0 (!%p187_p2), %v2418_v2  ;;  %2269 = vmatprep.subr.mxu1 (!%p187_p2), %v2418_v2  ;;  %v223_v3 = vld [vmem:[%s2678_s1 + $0x10] sm:$0xff] (!%p187_p2)  ;;  %v224_v5 = vld [vmem:[%s2678_s1 + $0x18] sm:$0xff] (!%p187_p2)  ;;  %v225_v6 = vld [vmem:[%s2678_s1 + $0x20] sm:$0xff] (!%p187_p2) }
   0x7   : > { %2265 = vmatpush3.msra.mxu0 (!%p187_p2), %v221_v0  ;;  %2266 = vmatprep.mubr.msk.f32.mxu0 (!%p187_p2), %vm2419_vm0, %v2418_v2  ;;  %v226_v7 = vld [vmem:[%s2678_s1 + $0x28] sm:$0xff] (!%p187_p2)  ;;  %v227_v8 = vld [vmem:[%s2678_s1 + $0x30] sm:$0xff] (!%p187_p2)  ;;  %v228_v9 = vld [vmem:[%s2678_s1 + $0x38] sm:$0xff] (!%p187_p2) }
   0x8   : > { %2270 = vmatpush3.msra.mxu1 (!%p187_p2), %v222_v1  ;;  %2271 = vmatprep.mubr.msk.f32.mxu1 (!%p187_p2), %vm2419_vm0, %v2418_v2  ;;  %v229_v10 = vld [vmem:[%s2678_s1 + $0x40] sm:$0xff] (!%p187_p2)  ;;  %v230_v11 = vld [vmem:[%s2678_s1 + $0x48] sm:$0xff] (!%p187_p2)  ;;  %v231_v12 = vld [vmem:[%s2678_s1 + $0x50] sm:$0xff] (!%p187_p2) }
   0x9   : > { %2274 = vmatprep.subr.mxu0 (!%p187_p2), %v2418_v2  ;;  %2279 = vmatprep.subr.mxu1 (!%p187_p2), %v2418_v2  ;;  %v232_v13 = vld [vmem:[%s2678_s1 + $0x58] sm:$0xff] (!%p187_p2)  ;;  %v2177_v22 = vld [vmem:[%s2679_s2 + $0x4] ss:$0 sm:$0xff] (!%p187_p2)  ;;  %v2178_v23 = vld [vmem:[%s2679_s2 + $0x5] ss:$0 sm:$0xff] (!%p187_p2) }
   0xa   : > { %v2173_v26 = vld [vmem:[%s2679_s2] ss:$0 sm:$0xff] (!%p187_p2)  ;;  %v2174_v27 = vld [vmem:[%s2679_s2 + $0x1] ss:$0 sm:$0xff] (!%p187_p2)  ;;  %v2179_v32 = vld [vmem:[%s2679_s2 + $0x6] ss:$0 sm:$0xff] (!%p187_p2) }
   0xb   : > { %v2180_v33 = vld [vmem:[%s2679_s2 + $0x7] ss:$0 sm:$0xff] (!%p187_p2)  ;;  %v2175_v38 = vld [vmem:[%s2679_s2 + $0x2] ss:$0 sm:$0xff] (!%p187_p2)  ;;  %v2176_v39 = vld [vmem:[%s2679_s2 + $0x3] ss:$0 sm:$0xff] (!%p187_p2) }
   0xc   : > { %v2181_v46 = vld [vmem:[%s2679_s2 + $0x8] ss:$0 sm:$0xff] (!%p187_p2)  ;;  %v2182_v47 = vld [vmem:[%s2679_s2 + $0x9] ss:$0 sm:$0xff] (!%p187_p2) }
   0xd   : > { %s2684_s19 = smov (!%p212_p3, %s2166_s19), 1 }
   0xe   : > { %s2171_s24 = sshll.u32 %s2684_s19, 3 }
   0xf   : > { %s215_s27 = scalar_lea.vmem %s2677_s0, %s2171_s24  ;;  %s219_s15 = scalar_lea.vmem %s2682_s5, %s2171_s24 }
  0x10   : > { %v220_v4 = vld [vmem:[%s215_s27] sm:$0xff] }
  0x11   : > { %2267 = vmatmul.mubr.msk.f32.vlgmr.msra.gmra.mrb[0].mxu0 %vm317_vm1, %v220_v4  ;;  %2272 = vmatmul.mubr.msk.f32.vlgmr.msra.gmra.mrb[0].mxu1 %vm317_vm1, %v220_v4 }
  0x12   : > { %2275 = vmatpush3.msra.mxu0 %v223_v3  ;;  %2276 = vmatprep.mubr.msk.f32.mxu0 %vm2419_vm0, %v2418_v2 }
  0x13   : > { %2280 = vmatpush3.msra.mxu1 %v224_v5  ;;  %2281 = vmatprep.mubr.msk.f32.mxu1 %vm2419_vm0, %v2418_v2 }
  0x14   : > { %2284 = vmatprep.subr.mxu0 %v2418_v2  ;;  %2289 = vmatprep.subr.mxu1 %v2418_v2 }
  0x15   : > { %2277 = vmatmul.mubr.msk.f32.vlgmr.msra.gmra.mrb[2].mxu0 %vm317_vm1, %v220_v4  ;;  %2282 = vmatmul.mubr.msk.f32.vlgmr.msra.gmra.mrb[2].mxu1 %vm317_vm1, %v220_v4 }
  0x16   : > { %2285 = vmatpush3.msra.mxu0 %v225_v6  ;;  %2286 = vmatprep.mubr.msk.f32.mxu0 %vm2419_vm0, %v2418_v2 }
  0x17   : > { %2290 = vmatpush3.msra.mxu1 %v226_v7  ;;  %2291 = vmatprep.mubr.msk.f32.mxu1 %vm2419_vm0, %v2418_v2 }
  0x18   : > { %2294 = vmatprep.subr.mxu0 %v2418_v2  ;;  %2299 = vmatprep.subr.mxu1 %v2418_v2 }
  0x19   : > { %2287 = vmatmul.mubr.msk.f32.vlgmr.msra.gmra.mrb[4].mxu0 %vm317_vm1, %v220_v4  ;;  %2292 = vmatmul.mubr.msk.f32.vlgmr.msra.gmra.mrb[4].mxu1 %vm317_vm1, %v220_v4 }
  0x1a   : > { %2295 = vmatpush3.msra.mxu0 %v227_v8  ;;  %2296 = vmatprep.mubr.msk.f32.mxu0 %vm2419_vm0, %v2418_v2 }
  0x1b   : > { %2300 = vmatpush3.msra.mxu1 %v228_v9  ;;  %2301 = vmatprep.mubr.msk.f32.mxu1 %vm2419_vm0, %v2418_v2 }
  0x1c   : > { %2304 = vmatprep.subr.mxu0 %v2418_v2  ;;  %2309 = vmatprep.subr.mxu1 %v2418_v2 }
  0x1d   : > { %2297 = vmatmul.mubr.msk.f32.vlgmr.msra.gmra.mrb[6].mxu0 %vm317_vm1, %v220_v4  ;;  %2302 = vmatmul.mubr.msk.f32.vlgmr.msra.gmra.mrb[6].mxu1 %vm317_vm1, %v220_v4 }
  0x1e   : > { %2306 = vmatprep.mubr.msk.f32.mxu0 %vm2419_vm0, %v2418_v2  ;;  %2311 = vmatprep.mubr.msk.f32.mxu1 %vm2419_vm0, %v2418_v2 }
  0x1f   : > { %2305 = vmatpush3.msra.mxu0 %v229_v10  ;;  %2310 = vmatpush3.msra.mxu1 %v230_v11 }
  0x20   : > { %2314 = vmatprep.subr.mxu0 %v2418_v2  ;;  %2319 = vmatprep.subr.mxu1 %v2418_v2 }
  0x21   : > { %2307 = vmatmul.mubr.msk.f32.vlgmr.msra.gmra.mrb[8].mxu0 %vm317_vm1, %v220_v4  ;;  %2312 = vmatmul.mubr.msk.f32.vlgmr.msra.gmra.mrb[8].mxu1 %vm317_vm1, %v220_v4 }
  0x22   : > { %2315 = vmatpush3.msra.mxu0 %v231_v12  ;;  %2320 = vmatpush3.msra.mxu1 %v232_v13 }
  0x23   : > { %2316 = vmatprep.mubr.msk.f32.mxu0 %vm2419_vm0, %v2418_v2  ;;  %2321 = vmatprep.mubr.msk.f32.mxu1 %vm2419_vm0, %v2418_v2 }
  0x24   : > { %2324 = vmatprep.subr.mxu0 %v2418_v2  ;;  %2329 = vmatprep.subr.mxu1 %v2418_v2 }
  0x25   : > { %2317 = vmatmul.mubr.msk.f32.vlgmr.msra.gmra.mrb[10].mxu0 %vm317_vm1, %v220_v4  ;;  %2322 = vmatmul.mubr.msk.f32.vlgmr.msra.gmra.mrb[10].mxu1 %vm317_vm1, %v220_v4 }
  0x26   : > { %2326 = vmatprep.mubr.msk.f32.mxu0 %vm2419_vm0, %v2418_v2  ;;  %2331 = vmatprep.mubr.msk.f32.mxu1 %vm2419_vm0, %v2418_v2 }
  0xe4   : > { %v387_v14 = vpop.f32.mrb[0].mxu0  ;;  %v457_v15 = vpop.f32.mrb[0].mxu1 }
  0xe5   : > { %v2268_v16 = vpop.f32.mrb[1].mxu0  ;;  %v2273_v17 = vpop.f32.mrb[1].mxu1  ;;  %v388_v34 = vadd.f32 %v2173_v26, %v387_v14  ;;  %v458_v35 = vadd.f32 %v2174_v27, %v457_v15 }
  0xe8   : > { %v527_v18 = vpop.f32.mrb[2].mxu0  ;;  %v597_v19 = vpop.f32.mrb[2].mxu1 }
  0xe9   : > { %v2278_v20 = vpop.f32.mrb[3].mxu0  ;;  %v2283_v21 = vpop.f32.mrb[3].mxu1  ;;  %v528_v44 = vadd.f32 %v2175_v38, %v527_v18  ;;  %v598_v45 = vadd.f32 %v2176_v39, %v597_v19 }
  0xec   : > { %v667_v24 = vpop.f32.mrb[4].mxu0  ;;  %v737_v25 = vpop.f32.mrb[4].mxu1 }
  0xed   : > { %v668_v28 = vadd.f32 %v2177_v22, %v667_v24  ;;  %v738_v29 = vadd.f32 %v2178_v23, %v737_v25  ;;  %v2288_v30 = vpop.f32.mrb[5].mxu0  ;;  %v2293_v31 = vpop.f32.mrb[5].mxu1 }
  0xee   : > { %v2183_v31 = vld [vmem:[%s2679_s2 + $0xa] ss:$0 sm:$0xff] }
  0xef   : > { %2325 = vmatpush3.xpose.msk.msra.mxu0 %vm317_vm1, %v668_v28  ;;  %2330 = vmatpush3.xpose.msk.msra.mxu1 %vm317_vm1, %v738_v29 }
  0xf0   : > { %v807_v36 = vpop.f32.mrb[6].mxu0  ;;  %v877_v37 = vpop.f32.mrb[6].mxu1  ;;  %2334 = vmatprep.subr.mxu0 %v2418_v2  ;;  %2339 = vmatprep.subr.mxu1 %v2418_v2 }
  0xf1   : > { %v808_v40 = vadd.f32 %v2179_v32, %v807_v36  ;;  %v878_v41 = vadd.f32 %v2180_v33, %v877_v37  ;;  %v2298_v42 = vpop.f32.mrb[7].mxu0  ;;  %v2303_v43 = vpop.f32.mrb[7].mxu1 }
  0xf2   : > { %2327 = vmatmul.mubr.msk.f32.vlgmr.msra.gmra.mrb[12].mxu0 %vm317_vm1, %v388_v34  ;;  %2332 = vmatmul.mubr.msk.f32.vlgmr.msra.gmra.mrb[12].mxu1 %vm317_vm1, %v458_v35  ;;  %v2184_v35 = vld [vmem:[%s2679_s2 + $0xb] ss:$0 sm:$0xff]  ;;  %v1801_v43 = vld [vmem:[%s2680_s3] sm:$0xff] }
  0xf3   : > { %2335 = vmatpush3.xpose.msk.msra.mxu0 %vm317_vm1, %v808_v40  ;;  %2340 = vmatpush3.xpose.msk.msra.mxu1 %vm317_vm1, %v878_v41 }
  0xf4   : > { %2336 = vmatprep.mubr.msk.f32.mxu0 %vm2419_vm0, %v2418_v2  ;;  %2341 = vmatprep.mubr.msk.f32.mxu1 %vm2419_vm0, %v2418_v2  ;;  %v947_v48 = vpop.f32.mrb[8].mxu0  ;;  %v1017_v51 = vpop.f32.mrb[8].mxu1 }
  0xf5   : > { %2344 = vmatprep.subr.mxu0 %v2418_v2  ;;  %2349 = vmatprep.subr.mxu1 %v2418_v2  ;;  %v948_v49 = vadd.f32 %v2181_v46, %v947_v48  ;;  %v2308_v50 = vpop.f32.mrb[9].mxu0  ;;  %v1018_v52 = vadd.f32 %v2182_v47, %v1017_v51  ;;  %v2313_v53 = vpop.f32.mrb[9].mxu1  ;;  %v1804_v48 = vld [vmem:[%s2680_s3 + $0x18] sm:$0xff] }
  0xf6   : > { %2337 = vmatmul.mubr.msk.f32.vlgmr.msra.gmra.mrb[14].mxu0 %vm317_vm1, %v528_v44  ;;  %2342 = vmatmul.mubr.msk.f32.vlgmr.msra.gmra.mrb[14].mxu1 %vm317_vm1, %v598_v45  ;;  %v1802_v44 = vld [vmem:[%s2680_s3 + $0x8] sm:$0xff]  ;;  %v1803_v45 = vld [vmem:[%s2680_s3 + $0x10] sm:$0xff] }
  0xf7   : > { %2346 = vmatprep.mubr.msk.f32.mxu0 %vm2419_vm0, %v2418_v2  ;;  %2351 = vmatprep.mubr.msk.f32.mxu1 %vm2419_vm0, %v2418_v2 }
  0xf8   : > { %2345 = vmatpush3.msra.mxu0 %v948_v49  ;;  %v1087_v54 = vpop.f32.mrb[10].mxu0  ;;  %2350 = vmatpush3.msra.mxu1 %v1018_v52  ;;  %v2607_v56 = vpop.f32.mrb[10].mxu1 }
  0xf9   : > { %2354 = vmatprep.subr.mxu0 %v2418_v2  ;;  %v2318_v55 = vpop.f32.mrb[11].mxu0  ;;  %2359 = vmatprep.subr.mxu1 %v2418_v2  ;;  %v2323_v57 = vpop.f32.mrb[11].mxu1  ;;  %v1088_v34 = vadd.f32 %v2183_v31, %v1087_v54  ;;  %v1158_v39 = vadd.f32 %v2184_v35, %v2607_v56 }
 0x1c5   : > { %v1233_v58 = vpop.f32.mrb[12].mxu0  ;;  %v1309_v59 = vpop.f32.mrb[12].mxu1 }
 0x1c6   : > { %v2328_v60 = vpop.f32.mrb[13].mxu0  ;;  %v2333_v61 = vpop.f32.mrb[13].mxu1  ;;  %v1465_v62 = vsel %vm317_vm1, %v1233_v58, -inf  ;;  %v1468_v4 = vsel %vm317_vm1, %v1309_v59, -inf }
 0x1c7   : > { %1466 = vmax.xlane.f32.xlu0 %v1465_v62 }
 0x1c9   : > { %v1385_v63 = vpop.f32.mrb[14].mxu0  ;;  %v1461_v0 = vpop.f32.mrb[14].mxu1 }
 0x1ca   : > { %v2338_v1 = vpop.f32.mrb[15].mxu0  ;;  %v2343_v3 = vpop.f32.mrb[15].mxu1  ;;  %v1471_v5 = vsel %vm317_vm1, %v1385_v63, -inf  ;;  %v1474_v6 = vsel %vm317_vm1, %v1461_v0, -inf }
 0x1cb   : > { %1469 = vmax.xlane.f32.xlu0 %v1468_v4  ;;  %1472 = vmax.xlane.f32.xlu1 %v1471_v5  ;;  %v2213_v4 = vld [vmem:[%s2681_s4] ss:$0 sm:$0xff] }
 0x1cf   : > { %1475 = vmax.xlane.f32.xlu1 %v1474_v6 }
 0x254   : > { %v1467_v7 = vpop.xlane.xlu0 %1466 }
 0x255   : > { %v1477_v8 = vsub.f32 %v1233_v58, %v1467_v7 }
 0x257   : > { %v1481_v9 = vmul.f32 1.442695, %v1477_v8 }
 0x258   : > { %v1470_v10 = vpop.xlane.xlu0 %1469  ;;  %v1473_v11 = vpop.xlane.xlu1 %1472 }
 0x259   : > { %2394 = vpow2.f32 %v1481_v9  ;;  %v1478_v12 = vsub.f32 %v1309_v59, %v1470_v10  ;;  %v1479_v13 = vsub.f32 %v1385_v63, %v1473_v11 }
 0x25b   : > { %v1483_v14 = vmul.f32 1.442695, %v1478_v12  ;;  %v1485_v15 = vmul.f32 1.442695, %v1479_v13 }
 0x25c   : > { %v1476_v16 = vpop.xlane.xlu1 %1475 }
 0x25d   : > { %2396 = vpow2.f32 %v1483_v14  ;;  %v1480_v17 = vsub.f32 %v1461_v0, %v1476_v16 }
 0x25e   : > { %2398 = vpow2.f32 %v1485_v15 }
 0x25f   : > { %v1487_v18 = vmul.f32 1.442695, %v1480_v17 }
 0x261   : > { %2400 = vpow2.f32 %v1487_v18 }
 0x263   : > { %v2395_v19 = vpop.eup %2394 }
 0x264   : > { %v1489_v20 = vsel %vm317_vm1, %v2395_v19, 0.0 }
 0x265   : > { %1490 = vadd.xlane.f32.xlu0 %v1489_v20 }
 0x267   : > { %v2397_v21 = vpop.eup %2396 }
 0x268   : > { %v2399_v22 = vpop.eup %2398  ;;  %v1492_v23 = vsel %vm317_vm1, %v2397_v21, 0.0 }
 0x269   : > { %1493 = vadd.xlane.f32.xlu1 %v1492_v23  ;;  %v1495_v24 = vsel %vm317_vm1, %v2399_v22, 0.0 }
 0x26a   : > { %1496 = vadd.xlane.f32.xlu0 %v1495_v24 }
 0x26b   : > { %v2401_v25 = vpop.eup %2400 }
 0x26c   : > { %v1498_v26 = vsel %vm317_vm1, %v2401_v25, 0.0 }
 0x26d   : > { %1499 = vadd.xlane.f32.xlu1 %v1498_v26 }
 0x2f2   : > { %v1491_v27 = vpop.xlane.xlu0 %1490 }
 0x2f3   : > { %2402 = vrcp.f32 %v1491_v27 }
 0x2f6   : > { %v1494_v28 = vpop.xlane.xlu1 %1493 }
 0x2f7   : > { %v1497_v29 = vpop.xlane.xlu0 %1496  ;;  %2404 = vrcp.f32 %v1494_v28 }
 0x2f8   : > { %2406 = vrcp.f32 %v1497_v29 }
 0x2fa   : > { %v1500_v30 = vpop.xlane.xlu1 %1499 }
 0x2fb   : > { %2408 = vrcp.f32 %v1500_v30 }
 0x2fd   : > { %v2403_v32 = vpop.eup %2402 }
 0x2fe   : > { %v1505_v33 = vmul.f32 %v2403_v32, %v2395_v19 }
 0x300   : > { %2347 = vmatmul.mubr.msk.f32.vlgmr.msra.gmra.mrb[16].mxu0 %vm317_vm1, %v1505_v33 }
 0x301   : > { %v2405_v36 = vpop.eup %2404  ;;  %2355 = vmatpush3.msra.mxu0 %v1088_v34  ;;  %2356 = vmatprep.mubr.msk.f32.mxu0 %vm2419_vm0, %v2418_v2 }
 0x302   : > { %v2407_v37 = vpop.eup %2406  ;;  %v1506_v38 = vmul.f32 %v2405_v36, %v2397_v21  ;;  %2364 = vmatprep.subr.mxu0 %v2418_v2 }
 0x303   : > { %v1507_v40 = vmul.f32 %v2407_v37, %v2399_v22 }
 0x304   : > { %2352 = vmatmul.mubr.msk.f32.vlgmr.msra.gmra.mrb[16].mxu1 %vm317_vm1, %v1506_v38 }
 0x305   : > { %v2409_v41 = vpop.eup %2408  ;;  %2357 = vmatmul.mubr.msk.f32.vlgmr.msra.gmra.mrb[18].mxu0 %vm317_vm1, %v1507_v40  ;;  %2360 = vmatpush3.msra.mxu1 %v1158_v39 }
 0x306   : > { %v1508_v42 = vmul.f32 %v2409_v41, %v2401_v25  ;;  %2361 = vmatprep.mubr.msk.f32.mxu1 %vm2419_vm0, %v2418_v2  ;;  %2366 = vmatprep.mubr.msk.f32.mxu0 %vm2419_vm0, %v2418_v2 }
 0x307   : > { %2369 = vmatprep.subr.mxu1 %v2418_v2  ;;  %2365 = vmatpush3.msra.mxu0 %v1801_v43 }
 0x308   : > { %2362 = vmatmul.mubr.msk.f32.vlgmr.msra.gmra.mrb[18].mxu1 %vm317_vm1, %v1508_v42  ;;  %2374 = vmatprep.subr.mxu0 %v2418_v2 }
 0x309   : > { %2371 = vmatprep.mubr.msk.f32.mxu1 %vm2419_vm0, %v2418_v2  ;;  %2370 = vmatpush3.msra.mxu1 %v1802_v44 }
 0x30a   : > { %2379 = vmatprep.subr.mxu1 %v2418_v2 }
 0x3d3   : > { %v1578_v46 = vpop.f32.mrb[16].mxu0 }
 0x3d4   : > { %v2348_v47 = vpop.f32.mrb[17].mxu0  ;;  %2367 = vmatmul.mubr.msk.f32.vlgmr.msra.gmra.mrb[20].mxu0 %vm317_vm1, %v1578_v46 }
 0x3d5   : > { %2375 = vmatpush3.msra.mxu0 %v1803_v45  ;;  %2376 = vmatprep.mubr.msk.f32.mxu0 %vm2419_vm0, %v2418_v2 }
 0x3d7   : > { %v1651_v49 = vpop.f32.mrb[16].mxu1 }
 0x3d8   : > { %v1724_v50 = vpop.f32.mrb[18].mxu0  ;;  %v2353_v51 = vpop.f32.mrb[17].mxu1  ;;  %2372 = vmatmul.mubr.msk.f32.vlgmr.msra.gmra.mrb[20].mxu1 %vm317_vm1, %v1651_v49 }
 0x3d9   : > { %v2358_v52 = vpop.f32.mrb[19].mxu0  ;;  %2377 = vmatmul.mubr.msk.f32.vlgmr.msra.gmra.mrb[22].mxu0 %vm317_vm1, %v1724_v50  ;;  %2380 = vmatpush3.msra.mxu1 %v1804_v48 }
 0x3da   : > { %2381 = vmatprep.mubr.msk.f32.mxu1 %vm2419_vm0, %v2418_v2 }
 0x3db   : > { %v1797_v53 = vpop.f32.mrb[18].mxu1 }
 0x3dc   : > { %v2363_v54 = vpop.f32.mrb[19].mxu1  ;;  %2382 = vmatmul.mubr.msk.f32.vlgmr.msra.gmra.mrb[22].mxu1 %vm317_vm1, %v1797_v53 }
 0x4a7   : > { %v1874_v55 = vpop.f32.mrb[20].mxu0 }
 0x4a8   : > { %v2368_v56 = vpop.f32.mrb[21].mxu0  ;;  %v2097_v58 = vsel %vm317_vm1, %v1874_v55, 0.0 }
 0x4ab   : > { %v1947_v57 = vpop.f32.mrb[20].mxu1 }
 0x4ac   : > { %v2098_v59 = vsel %vm317_vm1, %v1947_v57, 0.0  ;;  %v2020_v60 = vpop.f32.mrb[22].mxu0  ;;  %v2373_v61 = vpop.f32.mrb[21].mxu1 }
 0x4ad   : > { %v2099_v62 = vadd.f32 %v2098_v59, %v2097_v58  ;;  %v2378_v63 = vpop.f32.mrb[23].mxu0  ;;  %v2100_v0 = vsel %vm317_vm1, %v2020_v60, 0.0 }
 0x4af   : > { %v2101_v1 = vadd.f32 %v2100_v0, %v2099_v62  ;;  %v2093_v2 = vpop.f32.mrb[22].mxu1 }
 0x4b0   : > { %v2102_v3 = vsel %vm317_vm1, %v2093_v2, 0.0  ;;  %v2383_v5 = vpop.f32.mrb[23].mxu1 }
 0x4b1   : > { %v2103_v6 = vadd.f32 %v2102_v3, %v2101_v1 }
 0x4b3   : > { %v2111_v7 = vadd.f32 %v2213_v4, %v2103_v6 }
 0x4b5   : > { %2112 = vst.msk [vmem:[%s219_s15] sm:$0xff] %vm317_vm1, %v2111_v7 }
 0x4b6 PF: > { %s15_s18 = sadd.s32 1, %s2416_s18  }
 0x4b7   : > { %p12_p4 = scmp.ge.s32.totalorder %s15_s18, 4  }
 0x4b9   :  { %14 = sbr.rel (!%p12_p4) target bundleno = 1 (0x1), region = 70 }

</bundles_post_ra>
